<compile_context>
chip_gen: v7x
topology: tpu7x:2x2x1
jax: 0.10.0
libtpu: 0.0.40
codegen_flags: <defaults>
</compile_context>

<pallas_src>
import functools

import jax
import jax.numpy as jnp
from jax.experimental import pallas as pl
from jax.experimental.pallas import tpu as pltpu


# ----------------------------------------------------------------------------
# Fused kernel: [conv(im2col matmul) + max-pool + bias + ReLU] x branches + FC.
# ----------------------------------------------------------------------------
def _fused_textcnn_kernel(*refs, filter_sizes, seq_len):
    n_branch = len(filter_sizes)
    emb_ref = refs[0]                                   # (B*S, E_pad)  bf16
    conv_w_refs = refs[1:1 + n_branch]                  # (fs*E_pad, F) bf16
    conv_b_refs = refs[1 + n_branch:1 + 2 * n_branch]   # (1, F)        f32
    fc_w_ref = refs[1 + 2 * n_branch]                   # (nb*F, O_pad) bf16
    fc_b_ref = refs[2 + 2 * n_branch]                   # (1, O_pad)    f32
    out_ref = refs[3 + 2 * n_branch]                    # (B, O_pad)    f32

    x = emb_ref[...]                                    # (B*S, E_pad)
    bs, e_pad = x.shape
    batch = bs // seq_len

    pooled = []
    for j, fs in enumerate(filter_sizes):
        l_out = seq_len - fs + 1
        rows = bs - fs + 1
        # im2col over the whole flattened batch; lane concat offsets are
        # multiples of 128 because E was padded to a multiple of 128.
        cols = jnp.concatenate([x[k:k + rows, :] for k in range(fs)],
                               axis=-1)                 # (rows, fs*E_pad)
        conv = jnp.dot(cols, conv_w_refs[j][...],
                       preferred_element_type=jnp.float32)   # (rows, F) f32
        # Per-example max over its valid window positions (rows straddling two
        # examples are simply never selected).
        pj = jnp.concatenate(
            [jnp.max(conv[b * seq_len:b * seq_len + l_out, :],
                     axis=0, keepdims=True) for b in range(batch)],
            axis=0)                                     # (B, F)
        # Bias + ReLU hoisted after the max-pool (both commute with max_t).
        pj = jnp.maximum(pj + conv_b_refs[j][...], 0.0)
        pooled.append(pj)

    cat = jnp.concatenate(pooled, axis=-1)              # (B, n_branch*F) f32
    # Dropout is identity at inference time.
    logits = jnp.dot(cat.astype(fc_w_ref.dtype), fc_w_ref[...],
                     preferred_element_type=jnp.float32) + fc_b_ref[...]
    out_ref[...] = logits.astype(out_ref.dtype)         # (B, O_pad)


# ----------------------------------------------------------------------------
# Wrapper: embedding gather + weight repacking (im2col layout, lane padding),
# then one pallas_call for the whole network body.
# ----------------------------------------------------------------------------
def cnn_forward(text, params, filter_sizes, *, compute_dtype=jnp.bfloat16):
    emb_table = params["embedding"]
    B, S = text.shape
    E = emb_table.shape[1]
    n_filters = params["convs"][0][0].shape[-1]
    n_branch = len(filter_sizes)
    output_dim = params["fc_w"].shape[1]

    e_pad = pl.cdiv(E, 128) * 128        # lane-align the contraction pieces
    o_pad = pl.cdiv(output_dim, 128) * 128  # lane-dense output slab

    # TODO(synk): at production sizes, move this gather into the kernel via
    # PrefetchScalarGridSpec + pl.Element so (B, S, E) never round-trips HBM.
    emb2d = jnp.take(emb_table, text.reshape(-1), axis=0)       # (B*S, E)
    if e_pad != E:
        emb2d = jnp.pad(emb2d, ((0, 0), (0, e_pad - E)))
    emb2d = emb2d.astype(compute_dtype)

    conv_ws, conv_bs = [], []
    for fs, (w, b) in zip(filter_sizes, params["convs"]):
        if e_pad != E:
            w = jnp.pad(w, ((0, 0), (0, e_pad - E), (0, 0)))     # (fs, E_pad, F)
        conv_ws.append(w.reshape(fs * e_pad, n_filters).astype(compute_dtype))
        conv_bs.append(b.reshape(1, n_filters).astype(jnp.float32))

    fc_w = jnp.pad(params["fc_w"],
                   ((0, 0), (0, o_pad - output_dim))).astype(compute_dtype)
    fc_b = jnp.pad(params["fc_b"].reshape(1, output_dim),
                   ((0, 0), (0, o_pad - output_dim))).astype(jnp.float32)

    kernel = functools.partial(_fused_textcnn_kernel,
                               filter_sizes=tuple(filter_sizes), seq_len=S)
    n_inputs = 1 + 2 * n_branch + 2
    vmem_spec = pl.BlockSpec(memory_space=pltpu.MemorySpace.VMEM)

    out = pl.pallas_call(
        kernel,
        out_shape=jax.ShapeDtypeStruct((B, o_pad), jnp.float32),
        in_specs=[vmem_spec] * n_inputs,
        out_specs=pl.BlockSpec(memory_space=pltpu.MemorySpace.VMEM),
    )(emb2d, *conv_ws, *conv_bs, fc_w, fc_b)

    return out[:, :output_dim]


# ----------------------------------------------------------------------------
# Pure-JAX reference (f32) for a numerical sanity check.
# ----------------------------------------------------------------------------
def _reference_forward(text, params, filter_sizes):
    emb = jnp.take(params["embedding"], text, axis=0)            # (B, S, E)
    B, S, E = emb.shape
    pooled = []
    for fs, (w, b) in zip(filter_sizes, params["convs"]):
        l_out = S - fs + 1
        conv = sum(jnp.einsum("bte,ef->btf", emb[:, k:k + l_out, :], w[k])
                   for k in range(fs)) + b.reshape(1, 1, -1)
        conv = jax.nn.relu(conv)
        pooled.append(jnp.max(conv, axis=1))                     # (B, F)
    cat = jnp.concatenate(pooled, axis=-1)
    return cat @ params["fc_w"] + params["fc_b"].reshape(1, -1)


def init_params(key, vocab, embed_dim, n_filters, filter_sizes, output_dim):
    keys = jax.random.split(key, 3 + 2 * len(filter_sizes))
    params = {
        "embedding": jax.random.normal(keys[0], (vocab, embed_dim),
                                       jnp.float32) * 0.1,
        "convs": [],
        "fc_w": jax.random.normal(keys[1],
                                  (len(filter_sizes) * n_filters, output_dim),
                                  jnp.float32) * 0.1,
        "fc_b": jax.random.normal(keys[2], (1, output_dim), jnp.float32) * 0.1,
    }
    for i, fs in enumerate(filter_sizes):
        w = jax.random.normal(keys[3 + 2 * i], (fs, embed_dim, n_filters),
                              jnp.float32) * 0.1
        b = jax.random.normal(keys[4 + 2 * i], (1, n_filters),
                              jnp.float32) * 0.1
        params["convs"].append((w, b))
    return params


if __name__ == "__main__":
    VOCAB = 50
    EMBED_DIM = 32
    N_FILTERS = 8
    FILTER_SIZES = (2, 3, 4)
    OUTPUT_DIM = 4
    BATCH = 2
    SEQ = 16

    key = jax.random.PRNGKey(0)
    pkey, tkey = jax.random.split(key)
    params = init_params(pkey, VOCAB, EMBED_DIM, N_FILTERS, FILTER_SIZES,
                         OUTPUT_DIM)
    text = jax.random.randint(tkey, (BATCH, SEQ), 0, VOCAB, dtype=jnp.int32)

    fwd = jax.jit(functools.partial(cnn_forward, filter_sizes=FILTER_SIZES))
    out = jax.block_until_ready(fwd(text, params))
    assert out.shape == (BATCH, OUTPUT_DIM), out.shape

    ref = _reference_forward(text, params, FILTER_SIZES)
    err = float(jnp.max(jnp.abs(out - ref)))
    assert err < 2e-2, f"max abs error {err} vs f32 reference"

    print("KERNEL_OK")
</pallas_src>

<mosaic_0001>
module attributes {stable_mosaic.version = 11 : i64} {
  func.func @_fused_textcnn_kernel(%arg0: memref<32x128xbf16, #tpu.memory_space<vmem>>, %arg1: memref<256x8xbf16, #tpu.memory_space<vmem>>, %arg2: memref<384x8xbf16, #tpu.memory_space<vmem>>, %arg3: memref<512x8xbf16, #tpu.memory_space<vmem>>, %arg4: memref<1x8xf32, #tpu.memory_space<vmem>>, %arg5: memref<1x8xf32, #tpu.memory_space<vmem>>, %arg6: memref<1x8xf32, #tpu.memory_space<vmem>>, %arg7: memref<24x128xbf16, #tpu.memory_space<vmem>>, %arg8: memref<1x128xf32, #tpu.memory_space<vmem>>, %arg9: memref<2x128xf32, #tpu.memory_space<vmem>>) attributes {dimension_semantics = [], scalar_prefetch = 0 : i64, scratch_operands = 0 : i64, tpu.core_type = #tpu.core_type<tc>} {
    %c0 = arith.constant 0 : index
    %c0_0 = arith.constant 0 : index
    %0 = vector.load %arg0[%c0, %c0_0] : memref<32x128xbf16, #tpu.memory_space<vmem>>, vector<32x128xbf16>
    %1 = vector.extract_strided_slice %0 {offsets = [0, 0], sizes = [31, 128], strides = [1, 1]} : vector<32x128xbf16> to vector<31x128xbf16>
    %2 = vector.extract_strided_slice %0 {offsets = [1, 0], sizes = [31, 128], strides = [1, 1]} : vector<32x128xbf16> to vector<31x128xbf16>
    %3 = tpu.concatenate %1, %2 in 1 : vector<31x128xbf16>, vector<31x128xbf16> -> vector<31x256xbf16>
    %c0_1 = arith.constant 0 : index
    %c0_2 = arith.constant 0 : index
    %4 = vector.load %arg1[%c0_1, %c0_2] : memref<256x8xbf16, #tpu.memory_space<vmem>>, vector<256x8xbf16>
    %cst = arith.constant dense<0.000000e+00> : vector<31x8xf32>
    %5 = tpu.matmul %3, %4, %cst {dimension_numbers = #tpu.dot_dimension_numbers<[1], [0], [0], [1], [0, 0, 1, 1], [], []>} : vector<31x256xbf16>, vector<256x8xbf16>, vector<31x8xf32> -> vector<31x8xf32>
    %6 = vector.extract_strided_slice %5 {offsets = [0, 0], sizes = [15, 8], strides = [1, 1]} : vector<31x8xf32> to vector<15x8xf32>
    %cst_3 = arith.constant dense<0xFF800000> : vector<8xf32>
    %7 = vector.multi_reduction <maximumf>, %6, %cst_3 [0] : vector<15x8xf32> to vector<8xf32>
    %8 = vector.shape_cast %7 : vector<8xf32> to vector<1x8xf32>
    %9 = vector.extract_strided_slice %5 {offsets = [16, 0], sizes = [15, 8], strides = [1, 1]} : vector<31x8xf32> to vector<15x8xf32>
    %cst_4 = arith.constant dense<0xFF800000> : vector<8xf32>
    %10 = vector.multi_reduction <maximumf>, %9, %cst_4 [0] : vector<15x8xf32> to vector<8xf32>
    %11 = vector.shape_cast %10 : vector<8xf32> to vector<1x8xf32>
    %12 = tpu.concatenate %8, %11 in 0 : vector<1x8xf32>, vector<1x8xf32> -> vector<2x8xf32>
    %c0_5 = arith.constant 0 : index
    %c0_6 = arith.constant 0 : index
    %13 = vector.load %arg4[%c0_5, %c0_6] : memref<1x8xf32, #tpu.memory_space<vmem>>, vector<1x8xf32>
    %14 = vector.broadcast %13 : vector<1x8xf32> to vector<2x8xf32>
    %15 = arith.addf %12, %14 : vector<2x8xf32>
    %cst_7 = arith.constant 0.000000e+00 : f32
    %16 = vector.broadcast %cst_7 : f32 to vector<2x8xf32>
    %17 = arith.maximumf %15, %16 : vector<2x8xf32>
    %18 = vector.extract_strided_slice %0 {offsets = [0, 0], sizes = [30, 128], strides = [1, 1]} : vector<32x128xbf16> to vector<30x128xbf16>
    %19 = vector.extract_strided_slice %0 {offsets = [1, 0], sizes = [30, 128], strides = [1, 1]} : vector<32x128xbf16> to vector<30x128xbf16>
    %20 = vector.extract_strided_slice %0 {offsets = [2, 0], sizes = [30, 128], strides = [1, 1]} : vector<32x128xbf16> to vector<30x128xbf16>
    %21 = tpu.concatenate %18, %19, %20 in 1 : vector<30x128xbf16>, vector<30x128xbf16>, vector<30x128xbf16> -> vector<30x384xbf16>
    %c0_8 = arith.constant 0 : index
    %c0_9 = arith.constant 0 : index
    %22 = vector.load %arg2[%c0_8, %c0_9] : memref<384x8xbf16, #tpu.memory_space<vmem>>, vector<384x8xbf16>
    %cst_10 = arith.constant dense<0.000000e+00> : vector<30x8xf32>
    %23 = tpu.matmul %21, %22, %cst_10 {dimension_numbers = #tpu.dot_dimension_numbers<[1], [0], [0], [1], [0, 0, 1, 1], [], []>} : vector<30x384xbf16>, vector<384x8xbf16>, vector<30x8xf32> -> vector<30x8xf32>
    %24 = vector.extract_strided_slice %23 {offsets = [0, 0], sizes = [14, 8], strides = [1, 1]} : vector<30x8xf32> to vector<14x8xf32>
    %cst_11 = arith.constant dense<0xFF800000> : vector<8xf32>
    %25 = vector.multi_reduction <maximumf>, %24, %cst_11 [0] : vector<14x8xf32> to vector<8xf32>
    %26 = vector.shape_cast %25 : vector<8xf32> to vector<1x8xf32>
    %27 = vector.extract_strided_slice %23 {offsets = [16, 0], sizes = [14, 8], strides = [1, 1]} : vector<30x8xf32> to vector<14x8xf32>
    %cst_12 = arith.constant dense<0xFF800000> : vector<8xf32>
    %28 = vector.multi_reduction <maximumf>, %27, %cst_12 [0] : vector<14x8xf32> to vector<8xf32>
    %29 = vector.shape_cast %28 : vector<8xf32> to vector<1x8xf32>
    %30 = tpu.concatenate %26, %29 in 0 : vector<1x8xf32>, vector<1x8xf32> -> vector<2x8xf32>
    %c0_13 = arith.constant 0 : index
    %c0_14 = arith.constant 0 : index
    %31 = vector.load %arg5[%c0_13, %c0_14] : memref<1x8xf32, #tpu.memory_space<vmem>>, vector<1x8xf32>
    %32 = vector.broadcast %31 : vector<1x8xf32> to vector<2x8xf32>
    %33 = arith.addf %30, %32 : vector<2x8xf32>
    %cst_15 = arith.constant 0.000000e+00 : f32
    %34 = vector.broadcast %cst_15 : f32 to vector<2x8xf32>
    %35 = arith.maximumf %33, %34 : vector<2x8xf32>
    %36 = vector.extract_strided_slice %0 {offsets = [0, 0], sizes = [29, 128], strides = [1, 1]} : vector<32x128xbf16> to vector<29x128xbf16>
    %37 = vector.extract_strided_slice %0 {offsets = [1, 0], sizes = [29, 128], strides = [1, 1]} : vector<32x128xbf16> to vector<29x128xbf16>
    %38 = vector.extract_strided_slice %0 {offsets = [2, 0], sizes = [29, 128], strides = [1, 1]} : vector<32x128xbf16> to vector<29x128xbf16>
    %39 = vector.extract_strided_slice %0 {offsets = [3, 0], sizes = [29, 128], strides = [1, 1]} : vector<32x128xbf16> to vector<29x128xbf16>
    %40 = tpu.concatenate %36, %37, %38, %39 in 1 : vector<29x128xbf16>, vector<29x128xbf16>, vector<29x128xbf16>, vector<29x128xbf16> -> vector<29x512xbf16>
    %c0_16 = arith.constant 0 : index
    %c0_17 = arith.constant 0 : index
    %41 = vector.load %arg3[%c0_16, %c0_17] : memref<512x8xbf16, #tpu.memory_space<vmem>>, vector<512x8xbf16>
    %cst_18 = arith.constant dense<0.000000e+00> : vector<29x8xf32>
    %42 = tpu.matmul %40, %41, %cst_18 {dimension_numbers = #tpu.dot_dimension_numbers<[1], [0], [0], [1], [0, 0, 1, 1], [], []>} : vector<29x512xbf16>, vector<512x8xbf16>, vector<29x8xf32> -> vector<29x8xf32>
    %43 = vector.extract_strided_slice %42 {offsets = [0, 0], sizes = [13, 8], strides = [1, 1]} : vector<29x8xf32> to vector<13x8xf32>
    %cst_19 = arith.constant dense<0xFF800000> : vector<8xf32>
    %44 = vector.multi_reduction <maximumf>, %43, %cst_19 [0] : vector<13x8xf32> to vector<8xf32>
    %45 = vector.shape_cast %44 : vector<8xf32> to vector<1x8xf32>
    %46 = vector.extract_strided_slice %42 {offsets = [16, 0], sizes = [13, 8], strides = [1, 1]} : vector<29x8xf32> to vector<13x8xf32>
    %cst_20 = arith.constant dense<0xFF800000> : vector<8xf32>
    %47 = vector.multi_reduction <maximumf>, %46, %cst_20 [0] : vector<13x8xf32> to vector<8xf32>
    %48 = vector.shape_cast %47 : vector<8xf32> to vector<1x8xf32>
    %49 = tpu.concatenate %45, %48 in 0 : vector<1x8xf32>, vector<1x8xf32> -> vector<2x8xf32>
    %c0_21 = arith.constant 0 : index
    %c0_22 = arith.constant 0 : index
    %50 = vector.load %arg6[%c0_21, %c0_22] : memref<1x8xf32, #tpu.memory_space<vmem>>, vector<1x8xf32>
    %51 = vector.broadcast %50 : vector<1x8xf32> to vector<2x8xf32>
    %52 = arith.addf %49, %51 : vector<2x8xf32>
    %cst_23 = arith.constant 0.000000e+00 : f32
    %53 = vector.broadcast %cst_23 : f32 to vector<2x8xf32>
    %54 = arith.maximumf %52, %53 : vector<2x8xf32>
    %55 = tpu.concatenate %17, %35, %54 in 1 : vector<2x8xf32>, vector<2x8xf32>, vector<2x8xf32> -> vector<2x24xf32>
    %56 = arith.truncf %55 : vector<2x24xf32> to vector<2x24xbf16>
    %c0_24 = arith.constant 0 : index
    %c0_25 = arith.constant 0 : index
    %57 = vector.load %arg7[%c0_24, %c0_25] : memref<24x128xbf16, #tpu.memory_space<vmem>>, vector<24x128xbf16>
    %cst_26 = arith.constant dense<0.000000e+00> : vector<2x128xf32>
    %58 = tpu.matmul %56, %57, %cst_26 {dimension_numbers = #tpu.dot_dimension_numbers<[1], [0], [0], [1], [0, 0, 1, 1], [], []>} : vector<2x24xbf16>, vector<24x128xbf16>, vector<2x128xf32> -> vector<2x128xf32>
    %c0_27 = arith.constant 0 : index
    %c0_28 = arith.constant 0 : index
    %59 = vector.load %arg8[%c0_27, %c0_28] : memref<1x128xf32, #tpu.memory_space<vmem>>, vector<1x128xf32>
    %60 = vector.broadcast %59 : vector<1x128xf32> to vector<2x128xf32>
    %61 = arith.addf %58, %60 : vector<2x128xf32>
    %c0_29 = arith.constant 0 : index
    %c0_30 = arith.constant 0 : index
    %62 = vector.load %arg9[%c0_29, %c0_30] : memref<2x128xf32, #tpu.memory_space<vmem>>, vector<2x128xf32>
    tpu.vector_store %arg9[%c0_29, %c0_30], %61 {strides = array<i32>} : memref<2x128xf32, #tpu.memory_space<vmem>>, vector<2x128xf32>,
    return
  }
}

</mosaic_0001>

<bundles_post_ra>
// kernel: cnn_forward.1
= control target key start
LH: loop header
LB: loop body
LE: loop exit
PB: predicated region body
PF: predicated region fallthrough
CT: control target
= control target key end

     0   :  { %vm50_vm0 = vsmask.f32 7424  ;;  %vm276_vm1 = vcmask 1046528   ;;  %vm601_vm2 = vsmask.f32 6400  ;;  %s1796_s0 = inlined_call_operand.vmem [shape: bf16[32,128], index: 0, kind: input, shape index: {}]   ;;  %s1797_s1 = inlined_call_operand.vmem [shape: bf16[256,8], index: 1, kind: input, shape index: {}]   ;;  %s1798_s2 = inlined_call_operand.vmem [shape: bf16[384,8], index: 2, kind: input, shape index: {}]   ;;  %s1799_s3 = inlined_call_operand.vmem [shape: bf16[512,8], index: 3, kind: input, shape index: {}]   ;;  %s1800_s4 = inlined_call_operand.vmem [shape: f32[1,8], index: 4, kind: input, shape index: {}]   ;;  %s1801_s5 = inlined_call_operand.vmem [shape: f32[1,8], index: 5, kind: input, shape index: {}]   ;;  %s1802_s6 = inlined_call_operand.vmem [shape: f32[1,8], index: 6, kind: input, shape index: {}]   ;;  %s1803_s7 = inlined_call_operand.vmem [shape: bf16[24,128], index: 7, kind: input, shape index: {}]   ;;  %s1804_s8 = inlined_call_operand.vmem [shape: f32[1,128], index: 8, kind: input, shape index: {}]   ;;  %s1805_s9 = inlined_call_operand.hbm [shape: f32[2,128], index: 9, kind: output, shape index: {}]  }
   0x1   :  { %v1327_v0 = vld [vmem:[%s1797_s1 + $0x40] sm:$0xff]   ;;  %v1329_v2 = vld [vmem:[%s1797_s1 + $0x48] sm:$0xff]   ;;  %v1331_v4 = vld [vmem:[%s1797_s1 + $0x50] sm:$0xff]  }
   0x2   :  { %v1328_v1 = vld [vmem:[%s1797_s1] sm:$0xff]   ;;  %1169 = vmatprep.subr.bf16.mxu0 %v1327_v0  ;;  %v1330_v3 = vld [vmem:[%s1797_s1 + $0x8] sm:$0xff]   ;;  %v1332_v5 = vld [vmem:[%s1797_s1 + $0x10] sm:$0xff]  }
   0x3   :  { %1170 = vmatpush3.bf16.msra.mxu0 %v1328_v1  ;;  %v1333_v6 = vld [vmem:[%s1797_s1 + $0x58] sm:$0xff]   ;;  %v1335_v8 = vld [vmem:[%s1797_s1 + $0x60] sm:$0xff]   ;;  %v1337_v12 = vld [vmem:[%s1797_s1 + $0x68] sm:$0xff]  }
   0x4   :  { %1171 = vmatprep.subr.bf16.mxu0 %v1329_v2  ;;  %v1334_v7 = vld [vmem:[%s1797_s1 + $0x18] sm:$0xff]   ;;  %v1339_v9 = vld [vmem:[%s1798_s2 + $0x40] sm:$0xff]   ;;  %v1343_v13 = vld [vmem:[%s1798_s2 + $0x48] sm:$0xff]  }
   0x5   :  { %v1340_v10 = vld [vmem:[%s1798_s2] sm:$0xff]   ;;  %1197 = vmatprep.subr.bf16.mxu1 %v1339_v9  ;;  %v1344_v14 = vld [vmem:[%s1798_s2 + $0x8] sm:$0xff]   ;;  %v1341_v16 = vld [vmem:[%s1797_s1 + $0x70] sm:$0xff]  }
   0x6   :  { %v1336_v11 = vld [vmem:[%s1797_s1 + $0x20] sm:$0xff]   ;;  %1198 = vmatpush3.bf16.msra.mxu1 %v1340_v10  ;;  %v1338_v15 = vld [vmem:[%s1797_s1 + $0x28] sm:$0xff]   ;;  %v1347_v17 = vld [vmem:[%s1798_s2 + $0x50] sm:$0xff]  }
   0x7   :  { %1172 = vmatpush3.bf16.msra.mxu0 %v1330_v3  ;;  %1199 = vmatprep.subr.bf16.mxu1 %v1343_v13  ;;  %v1342_v18 = vld [vmem:[%s1797_s1 + $0x30] sm:$0xff]   ;;  %v1345_v20 = vld [vmem:[%s1797_s1 + $0x78] sm:$0xff]   ;;  %v1548_v21 = vld [vmem:[%s1796_s0] sm:$0xff]  }
   0x8   :  { %1173 = vmatprep.subr.bf16.mxu0 %v1331_v4  ;;  %v1348_v19 = vld [vmem:[%s1798_s2 + $0x10] sm:$0xff]   ;;  %v1553_v22 = vld [vmem:[%s1796_s0 + $0x8] sm:$0xff]   ;;  %v1346_v23 = vld [vmem:[%s1797_s1 + $0x38] sm:$0xff]   ;;  %v52_v24 = vshrl.u32 %v1548_v21, 16  ;;  %v54_v25 = vshll.u32 %v1548_v21, 16  ;;  %v277_v42 = vrot.slane %v1548_v21, 1 }
   0x9   :  { %v59_v26 = vshll.u32 %v1553_v22, 16  ;;  %v1352_v27 = vld [vmem:[%s1798_s2 + $0x58] sm:$0xff]   ;;  %v1351_v30 = vld [vmem:[%s1798_s2 + $0x80] sm:$0xff]   ;;  %v63_v34 = vshrl.u32 %v1553_v22, 16  ;;  %v1354_v37 = vld [vmem:[%s1798_s2 + $0x88] sm:$0xff]   ;;  %v1607_v44 = vrot.slane %v1553_v22, 1 }
   0xa   :  { %1200 = vmatpush3.bf16.msra.mxu1 %v1344_v14  ;;  %v56_v28 = vrot.slane %v54_v25, 1  ;;  %v1353_v31 = vld [vmem:[%s1798_s2 + $0x18] sm:$0xff]   ;;  %v1355_v33 = vld [vmem:[%s1798_s2 + $0x60] sm:$0xff]   ;;  %v1358_v39 = vld [vmem:[%s1798_s2 + $0x68] sm:$0xff]  }
   0xb   :  { %1174 = vmatpush3.bf16.msra.mxu0 %v1332_v5  ;;  %1201 = vmatprep.subr.bf16.mxu1 %v1347_v17  ;;  %v61_v29 = vrot.slane %v59_v26, 1  ;;  %v1356_v35 = vld [vmem:[%s1798_s2 + $0x20] sm:$0xff]   ;;  %v1359_v40 = vld [vmem:[%s1798_s2 + $0x28] sm:$0xff]   ;;  %v1361_v41 = vld [vmem:[%s1798_s2 + $0x70] sm:$0xff]   ;;  %v1619_v48 = vsel %vm276_vm1, %v277_v42, %v1607_v44  ;;  %v605_v3 = vrot.slane %v63_v34, 1  ;;  %v606_v10 = vrot.slane %v59_v26, 2 }
   0xc   :  { %1175 = vmatprep.subr.bf16.mxu0 %v1333_v6  ;;  %v57_v32 = vor.u32 %v56_v28, %v52_v24  ;;  %v1357_v43 = vld [vmem:[%s1798_s2 + $0x90] sm:$0xff]   ;;  %v1364_v46 = vld [vmem:[%s1798_s2 + $0x78] sm:$0xff]   ;;  %v1369_v50 = vld [vmem:[%s1799_s3 + $0x40] sm:$0xff]   ;;  %v602_v6 = vrot.slane %v52_v24, 1 }
   0xd   :  { %v1589_v38 = vor.u32 %v63_v34, %v61_v29  ;;  %v1362_v45 = vld [vmem:[%s1798_s2 + $0x30] sm:$0xff]   ;;  %v1360_v47 = vld [vmem:[%s1798_s2 + $0x98] sm:$0xff]   ;;  %v1363_v51 = vld [vmem:[%s1798_s2 + $0xa0] sm:$0xff]  }
   0xe   :  { %1202 = vmatpush3.bf16.msra.mxu1 %v1348_v19  ;;  %v62_v36 = vsel %vm50_vm0, %v57_v32, %v61_v29  ;;  %v1365_v49 = vld [vmem:[%s1798_s2 + $0x38] sm:$0xff]   ;;  %v1370_v52 = vld [vmem:[%s1799_s3] sm:$0xff]   ;;  %v1372_v53 = vld [vmem:[%s1799_s3 + $0x48] sm:$0xff]  }
   0xf   :  { %1176 = vmatpush3.bf16.msra.mxu0 %v1334_v7  ;;  %1203 = vmatprep.subr.bf16.mxu1 %v1352_v27  ;;  %v1366_v54 = vld [vmem:[%s1798_s2 + $0xa8] sm:$0xff]   ;;  %v1376_v56 = vld [vmem:[%s1799_s3 + $0x50] sm:$0xff]   ;;  %v1380_v59 = vld [vmem:[%s1799_s3 + $0x58] sm:$0xff]  }
  0x10   :  { %1177 = vmatprep.subr.bf16.mxu0 %v1335_v8  ;;  %228 = vmatprep.mubr.bf16.mxu0 %v62_v36  ;;  %v1374_v55 = vld [vmem:[%s1799_s3 + $0x8] sm:$0xff]   ;;  %v1367_v57 = vld [vmem:[%s1798_s2 + $0xb0] sm:$0xff]   ;;  %v1368_v60 = vld [vmem:[%s1798_s2 + $0xb8] sm:$0xff]   ;;  %v603_v8 = vrot.slane %v54_v25, 2 }
  0x11   :  { %506 = vmatprep.mubr.bf16.mxu1 %v62_v36  ;;  %v1378_v58 = vld [vmem:[%s1799_s3 + $0x10] sm:$0xff]   ;;  %v1382_v61 = vld [vmem:[%s1799_s3 + $0x18] sm:$0xff]   ;;  %v1384_v62 = vld [vmem:[%s1799_s3 + $0x60] sm:$0xff]  }
  0x12   :  { %1204 = vmatpush3.bf16.msra.mxu1 %v1353_v31  ;;  %v1371_v63 = vld [vmem:[%s1799_s3 + $0xc0] sm:$0xff]   ;;  %v1388_v1 = vld [vmem:[%s1799_s3 + $0x68] sm:$0xff]   ;;  %v1392_v7 = vld [vmem:[%s1799_s3 + $0x70] sm:$0xff]  }
  0x13   :  { %1178 = vmatpush3.bf16.msra.mxu0 %v1336_v11  ;;  %1205 = vmatprep.subr.bf16.mxu1 %v1355_v33  ;;  %v1386_v0 = vld [vmem:[%s1799_s3 + $0x20] sm:$0xff]   ;;  %v1375_v4 = vld [vmem:[%s1799_s3 + $0xc8] sm:$0xff]   ;;  %v1379_v11 = vld [vmem:[%s1799_s3 + $0xd0] sm:$0xff]  }
  0x14   :  { %1179 = vmatprep.subr.bf16.mxu0 %v1337_v12  ;;  %v1373_v2 = vld [vmem:[%s1799_s3 + $0x80] sm:$0xff]   ;;  %v1390_v5 = vld [vmem:[%s1799_s3 + $0x28] sm:$0xff]   ;;  %v1394_v12 = vld [vmem:[%s1799_s3 + $0x30] sm:$0xff]  }
  0x15   :  { %v1377_v9 = vld [vmem:[%s1799_s3 + $0x88] sm:$0xff]   ;;  %v1396_v13 = vld [vmem:[%s1799_s3 + $0x78] sm:$0xff]   ;;  %v1381_v14 = vld [vmem:[%s1799_s3 + $0x90] sm:$0xff]  }
  0x16   :  { %1206 = vmatpush3.bf16.msra.mxu1 %v1356_v35  ;;  %v1383_v17 = vld [vmem:[%s1799_s3 + $0xd8] sm:$0xff]  }
  0x17   :  { %1180 = vmatpush3.bf16.msra.mxu0 %v1338_v15  ;;  %1207 = vmatprep.subr.bf16.mxu1 %v1358_v39  ;;  %v604_v15 = vor.u32 %v603_v8, %v602_v6  ;;  %v1385_v19 = vld [vmem:[%s1799_s3 + $0x98] sm:$0xff]  }
  0x18   :  { %1181 = vmatprep.subr.bf16.mxu0 %v1341_v16  ;;  %v607_v16 = vor.u32 %v606_v10, %v605_v3 }
  0x1a   :  { %1208 = vmatpush3.bf16.msra.mxu1 %v1359_v40 }
  0x1b   :  { %1182 = vmatpush3.bf16.msra.mxu0 %v1342_v18  ;;  %1209 = vmatprep.subr.bf16.mxu1 %v1361_v41  ;;  %v1398_v18 = vld [vmem:[%s1799_s3 + $0x38] sm:$0xff]  }
  0x1c   :  { %1183 = vmatprep.subr.bf16.mxu0 %v1345_v20  ;;  %v608_v20 = vsel %vm601_vm2, %v604_v15, %v607_v16 }
  0x1e   :  { %1210 = vmatpush3.bf16.msra.mxu1 %v1362_v45 }
  0x1f   :  { %1184 = vmatpush3.bf16.msra.mxu0 %v1346_v23  ;;  %1211 = vmatprep.subr.bf16.mxu1 %v1364_v46 }
  0x20   :  { %1294 = vmatprep.subr.bf16.mxu0 %v1351_v30 }
  0x22   :  { %229 = vmatmul.mubr.bf16.vlgmr.msra.gmra.mrb[0].mxu0 %v1548_v21  ;;  %1212 = vmatpush3.bf16.msra.mxu1 %v1365_v49 }
  0x23   :  { %1295 = vmatpush3.bf16.msra.mxu0 %v1351_v30  ;;  %236 = vmatprep.mubr.bf16.mxu0 %v1589_v38 }
  0x24   :  { %1296 = vmatprep.subr.bf16.mxu0 %v1354_v37  ;;  %1235 = vmatprep.subr.bf16.mxu1 %v1369_v50 }
  0x25   :  { %507 = vmatmul.mubr.bf16.vlgmr.msra.gmra.mrb[0].mxu1 %v1548_v21 }
  0x26   :  { %514 = vmatprep.mubr.bf16.mxu1 %v1589_v38  ;;  %1236 = vmatpush3.bf16.msra.mxu1 %v1370_v52 }
  0x27   :  { %1297 = vmatpush3.bf16.msra.mxu0 %v1354_v37  ;;  %1237 = vmatprep.subr.bf16.mxu1 %v1372_v53 }
  0x28   :  { %1298 = vmatprep.subr.bf16.mxu0 %v1357_v43 }
  0x2a   :  { %237 = vmatmul.mubr.bf16.gmra.mrb[4].mxu0 %v1553_v22  ;;  %1238 = vmatpush3.bf16.msra.mxu1 %v1374_v55 }
  0x2b   :  { %1299 = vmatpush3.bf16.msra.mxu0 %v1357_v43  ;;  %1310 = vmatprep.mubr.bf16.mxu0 %v1619_v48 }
  0x2c   :  { %1300 = vmatprep.subr.bf16.mxu0 %v1360_v47  ;;  %1239 = vmatprep.subr.bf16.mxu1 %v1376_v56 }
  0x2d   :  { %515 = vmatmul.mubr.bf16.gmra.mrb[4].mxu1 %v1553_v22 }
  0x2e   :  { %1240 = vmatpush3.bf16.msra.mxu1 %v1378_v58  ;;  %899 = vmatprep.mubr.bf16.mxu1 %v62_v36 }
  0x2f   :  { %1301 = vmatpush3.bf16.msra.mxu0 %v1360_v47  ;;  %1241 = vmatprep.subr.bf16.mxu1 %v1380_v59 }
  0x30   :  { %1302 = vmatprep.subr.bf16.mxu0 %v1363_v51 }
  0x32   :  { %1242 = vmatpush3.bf16.msra.mxu1 %v1382_v61 }
  0x33   :  { %1303 = vmatpush3.bf16.msra.mxu0 %v1363_v51  ;;  %1243 = vmatprep.subr.bf16.mxu1 %v1384_v62 }
  0x34   :  { %1304 = vmatprep.subr.bf16.mxu0 %v1366_v54 }
  0x36   :  { %1244 = vmatpush3.bf16.msra.mxu1 %v1386_v0 }
  0x37   :  { %1305 = vmatpush3.bf16.msra.mxu0 %v1366_v54  ;;  %1245 = vmatprep.subr.bf16.mxu1 %v1388_v1 }
  0x38   :  { %1306 = vmatprep.subr.bf16.mxu0 %v1367_v57 }
  0x3a   :  { %1246 = vmatpush3.bf16.msra.mxu1 %v1390_v5 }
  0x3b   :  { %1307 = vmatpush3.bf16.msra.mxu0 %v1367_v57  ;;  %1247 = vmatprep.subr.bf16.mxu1 %v1392_v7 }
  0x3c   :  { %1308 = vmatprep.subr.bf16.mxu0 %v1368_v60 }
  0x3e   :  { %1248 = vmatpush3.bf16.msra.mxu1 %v1394_v12 }
  0x3f   :  { %1309 = vmatpush3.bf16.msra.mxu0 %v1368_v60  ;;  %1249 = vmatprep.subr.bf16.mxu1 %v1396_v13 }
  0x40   :  { %1263 = vmatprep.subr.bf16.mxu0 %v1371_v63 }
  0x42   :  { %1311 = vmatmul.mubr.bf16.vlgmr.msra.gmra.mrb[8].mxu0 %v1607_v44 }
  0x43   :  { %1264 = vmatpush3.bf16.msra.mxu0 %v1373_v2 }
  0x44   :  { %1265 = vmatprep.subr.bf16.mxu0 %v1375_v4 }
  0x47   :  { %1266 = vmatpush3.bf16.msra.mxu0 %v1377_v9 }
  0x48   :  { %1267 = vmatprep.subr.bf16.mxu0 %v1379_v11 }
  0x4b   :  { %1268 = vmatpush3.bf16.msra.mxu0 %v1381_v14 }
  0x4c   :  { %14 = vsyncpa [#allocation3], 0  ;;  %1269 = vmatprep.subr.bf16.mxu0 %v1383_v17  ;;  %v1387_v23 = vld [vmem:[%s1799_s3 + $0xe0] sm:$0xff]   ;;  %948 = vmatprep.mubr.bf16.mxu0 %v608_v20  ;;  %v1391_v25 = vld [vmem:[%s1799_s3 + $0xe8] sm:$0xff]   ;;  %vm245_vm3 = vcmask 64512   ;;  %vm247_vm4 = vcmask 63488  }
  0x4d   :  { %1250 = vmatpush3.bf16.msra.mxu1 %v1398_v18  ;;  %v1389_v24 = vld [vmem:[%s1799_s3 + $0xa0] sm:$0xff]   ;;  %v1393_v26 = vld [vmem:[%s1799_s3 + $0xa8] sm:$0xff]   ;;  %v1395_v27 = vld [vmem:[%s1799_s3 + $0xf0] sm:$0xff]   ;;  %vm265_vm5 = vcmask 1040384   ;;  %vm573_vm6 = vcmask 62464   ;;  %vm1029_vm7 = vcmask 1043456  }
  0x4e   :  { %v1397_v28 = vld [vmem:[%s1799_s3 + $0xb0] sm:$0xff]   ;;  %v1400_v29 = vld [vmem:[%s1799_s3 + $0xb8] sm:$0xff]   ;;  %s1428_s2 = smov 8   ;;  %vm966_vm8 = vcmask 61440   ;;  %vm1429_vm9 = vmmov 0   ;;  %s1430_s24 = smov 16  }
  0x4f   :  { %1270 = vmatpush3.bf16.msra.mxu0 %v1385_v19  ;;  %vm1003_vm10 = vcmask 130048   ;;  %vm1025_vm11 = vcmask 195584   ;;  %s1431_s28 = smov [#allocation2]  }
  0x50   :  { %1271 = vmatprep.subr.bf16.mxu0 %v1387_v23  ;;  %900 = vmatmul.mubr.bf16.vlgmr.msra.gmra.mrb[8].mxu1 %v1548_v21  ;;  %v1399_v21 = vld [vmem:[%s1799_s3 + $0xf8] sm:$0xff]   ;;  %s1080_s29 = sshll.u32 %s1431_s28, 4  ;;  %s1081_s29 = int_to_ptr.vmem [resolvable:$true] %s1080_s29 }
  0x51   :  { %907 = vmatprep.mubr.bf16.mxu1 %v1589_v38  ;;  %p1408_p1 = scmp.lt.s32.totalorder %s1081_s29, %s1081_s29 }
  0x53   :  { %1272 = vmatpush3.bf16.msra.mxu0 %v1389_v24 }
  0x54   :  { %1273 = vmatprep.subr.bf16.mxu0 %v1391_v25 }
  0x57   :  { %1274 = vmatpush3.bf16.msra.mxu0 %v1393_v26 }
  0x58   :  { %1275 = vmatprep.subr.bf16.mxu0 %v1395_v27  ;;  %908 = vmatmul.mubr.bf16.gmra.mrb[12].mxu1 %v1553_v22 }
  0x5b   :  { %1276 = vmatpush3.bf16.msra.mxu0 %v1397_v28 }
  0x5c   :  { %1277 = vmatprep.subr.bf16.mxu0 %v1399_v21 }
  0x5f   :  { %1278 = vmatpush3.bf16.msra.mxu0 %v1400_v29  ;;  %v1401_v29 = vld [vmem:[%s1803_s7] sm:$0xff]  }
  0x62   :  { %949 = vmatmul.mubr.bf16.vlgmr.msra.gmra.mrb[12].mxu0 %v1619_v48 }
  0x63   :  { %956 = vmatprep.mubr.bf16.mxu0 %v607_v16 }
  0x6a   :  { %957 = vmatmul.mubr.bf16.gmra.mrb[16].mxu0 %v1607_v44 }
  0xf5   :  { %v1185_v30 = vpop.f32.mrb[0].mxu0 }
  0xf6   :  { %v1186_v31 = vpop.f32.mrb[1].mxu0 }
  0xf7   :  { %v1187_v32 = vadd.f32 %v1186_v31, %v1185_v30  ;;  %v1188_v33 = vpop.f32.mrb[2].mxu0  ;;  %v1402_v30 = vld [vmem:[%s1803_s7 + $0x8] ss:$0 sps:$4 sm:$0xff]  }
  0xf8   :  { %v1189_v34 = vpop.f32.mrb[3].mxu0  ;;  %v1213_v48 = vpop.f32.mrb[0].mxu1 }
  0xf9   :  { %v1190_v22 = vadd.f32 %v1189_v34, %v1188_v33  ;;  %v246_v35 = vsel %vm245_vm3, %v1187_v32, -inf  ;;  %v1214_v51 = vpop.f32.mrb[1].mxu1  ;;  %v1427_v33 = vmov 0.0  }
  0xfa   :  { %v1215_v52 = vadd.f32 %v1214_v51, %v1213_v48  ;;  %v1216_v53 = vpop.f32.mrb[2].mxu1  ;;  %1314 = vmatprep.subr.bf16.mxu1 %v1427_v33  ;;  %1318 = vmatprep.mubr.msk.bf16.mxu1 %vm1429_vm9, %v1427_v33 }
  0xfb   :  { %v248_v36 = vsel %vm247_vm4, %v1190_v22, -inf  ;;  %v1217_v55 = vpop.f32.mrb[3].mxu1  ;;  %1315 = vmatpush3.bf16.msra.mxu1 %v1401_v29 }
  0xfc   :  { %v249_v37 = vmax.f32 %v246_v35, %v248_v36  ;;  %v1218_v56 = vadd.f32 %v1217_v55, %v1216_v53  ;;  %1316 = vmatprep.subr.bf16.mxu1 %v1427_v33 }
  0xfd   :  { %v1191_v38 = vpop.f32.mrb[4].mxu0 }
  0xfe   :  { %v250_v39 = vrot.slane %v249_v37, 4  ;;  %v1192_v40 = vpop.f32.mrb[5].mxu0 }
  0xff   :  { %v1193_v41 = vadd.f32 %v1192_v40, %v1191_v38  ;;  %v1194_v42 = vpop.f32.mrb[6].mxu0  ;;  %v1031_v38 = vsel %vm1029_vm7, %v1402_v30, 0  ;;  %v1106_v30 = vld [vmem:[%s1800_s4] ss:$0 sm:$0xff]  ;;  %s1403_s4 = scalar_lea.vmem %s1081_s29, 32 }
 0x100   :  { %v251_v43 = vmax.f32 %v249_v37, %v250_v39  ;;  %v1195_v45 = vpop.f32.mrb[7].mxu0  ;;  %v1219_v60 = vpop.f32.mrb[4].mxu1  ;;  %1317 = vmatpush3.bf16.msra.mxu1 %v1031_v38  ;;  %p1404_p0 = scmp.ne.s32.totalorder %s1081_s29, %s1403_s4  ;;  %p1409_p2 = scmp.lt.s32.totalorder %s1403_s4, %s1403_s4 }
 0x101   :  { %v256_v44 = vsel %vm245_vm3, %v1193_v41, -inf  ;;  %v1196_v46 = vadd.f32 %v1195_v45, %v1194_v42  ;;  %v1220_v63 = vpop.f32.mrb[5].mxu1  ;;  %v1131_v45 = vld [vmem:[%s1801_s5] ss:$0 sm:$0xff] }
 0x102   :  { %v252_v49 = vrot.slane %v251_v43, 2  ;;  %v1221_v0 = vadd.f32 %v1220_v63, %v1219_v60  ;;  %v1222_v1 = vpop.f32.mrb[6].mxu1  ;;  %p1410_p3 = por %p1409_p2, %p1408_p1 }
 0x103   :  { %v257_v47 = vsel %vm247_vm4, %v1196_v46, -inf  ;;  %v1223_v3 = vpop.f32.mrb[7].mxu1 }
 0x104   :  { %v258_v50 = vmax.f32 %v256_v44, %v257_v47  ;;  %v253_v57 = vmax.f32 %v251_v43, %v252_v49  ;;  %v1224_v4 = vadd.f32 %v1223_v3, %v1222_v1  ;;  %p1411_p4 = pnand %p1410_p3, %p1404_p0 }
 0x106   :  { %v259_v54 = vrot.slane %v258_v50, 4  ;;  %v254_v61 = vrot.slane %v253_v57, 1 }
 0x108   :  { %v260_v58 = vmax.f32 %v258_v50, %v259_v54  ;;  %v255_v5 = vmax.f32 %v253_v57, %v254_v61 }
 0x10a   :  { %v261_v59 = vrot.slane %v260_v58, 2 }
 0x10c   :  { %v262_v62 = vmax.f32 %v260_v58, %v261_v59 }
 0x10e   :  { %v263_v2 = vrot.slane %v262_v62, 1 }
 0x110   :  { %v264_v6 = vmax.f32 %v262_v62, %v263_v2 }
 0x112   :  { %v1754_v7 = vsel %vm265_vm5, %v255_v5, %v264_v6 }
 0x115   :  { %v1312_v8 = vpop.f32.mrb[8].mxu0 }
 0x116   :  { %v566_v9 = vadd.f32 %v1312_v8, %v1221_v0  ;;  %v557_v10 = vpop.f32.mrb[9].mxu0 }
 0x117   :  { %v558_v11 = vadd.f32 %v1215_v52, %v557_v10  ;;  %v1313_v12 = vpop.f32.mrb[10].mxu0 }
 0x118   :  { %v582_v13 = vsel %vm245_vm3, %v566_v9, -inf  ;;  %v569_v14 = vadd.f32 %v1313_v12, %v1224_v4  ;;  %v560_v15 = vpop.f32.mrb[11].mxu0 }
 0x119   :  { %v561_v16 = vadd.f32 %v1218_v56, %v560_v15  ;;  %v572_v18 = vsel %vm245_vm3, %v558_v11, -inf }
 0x11a   :  { %v583_v17 = vsel %vm573_vm6, %v569_v14, -inf }
 0x11b   :  { %v584_v19 = vmax.f32 %v582_v13, %v583_v17  ;;  %v574_v20 = vsel %vm573_vm6, %v561_v16, -inf }
 0x11c   :  { %v575_v23 = vmax.f32 %v572_v18, %v574_v20 }
 0x11d   :  { %v585_v24 = vrot.slane %v584_v19, 4 }
 0x11e   :  { %v576_v25 = vrot.slane %v575_v23, 4 }
 0x11f   :  { %v586_v26 = vmax.f32 %v584_v19, %v585_v24 }
 0x120   :  { %v577_v27 = vmax.f32 %v575_v23, %v576_v25 }
 0x121   :  { %v587_v28 = vrot.slane %v586_v26, 2 }
 0x122   :  { %v578_v21 = vrot.slane %v577_v27, 2 }
 0x123   :  { %v588_v31 = vmax.f32 %v586_v26, %v587_v28  ;;  %v1251_v32 = vpop.f32.mrb[8].mxu1 }
 0x124   :  { %v579_v34 = vmax.f32 %v577_v27, %v578_v21  ;;  %v1252_v22 = vpop.f32.mrb[9].mxu1  ;;  %v1164_v27 = vld [vmem:[%s1802_s6] ss:$0 sm:$0xff] }
 0x125   :  { %v589_v35 = vrot.slane %v588_v31, 1  ;;  %v1253_v36 = vadd.f32 %v1252_v22, %v1251_v32  ;;  %v1254_v37 = vpop.f32.mrb[10].mxu1 }
 0x126   :  { %v580_v39 = vrot.slane %v579_v34, 1  ;;  %v1255_v40 = vpop.f32.mrb[11].mxu1 }
 0x127   :  { %v590_v41 = vmax.f32 %v588_v31, %v589_v35  ;;  %v1256_v42 = vadd.f32 %v1255_v40, %v1254_v37  ;;  %v274_v31 = vadd.f32 %v1106_v30, %v1754_v7  ;;  %v1165_v37 = vld [vmem:[%s1804_s8] ss:$0 sm:$0xff] }
 0x128   :  { %v581_v43 = vmax.f32 %v579_v34, %v580_v39 }
 0x129   :  { %v275_v33 = vmax.f32 %v274_v31, 0.0 }
 0x12a   :  { %v591_v44 = vsel %vm265_vm5, %v581_v43, %v590_v41 }
 0x12b   :  { %v599_v46 = vadd.f32 %v1131_v45, %v591_v44  ;;  %v1257_v47 = vpop.f32.mrb[12].mxu1 }
 0x12c   :  { %v1258_v48 = vpop.f32.mrb[13].mxu1 }
 0x12d   :  { %v600_v49 = vmax.f32 %v599_v46, 0.0  ;;  %v1259_v50 = vadd.f32 %v1258_v48, %v1257_v47  ;;  %v1260_v51 = vpop.f32.mrb[14].mxu1 }
 0x12e   :  { %v1261_v52 = vpop.f32.mrb[15].mxu1 }
 0x12f   :  { %995 = vrot.lane.b32.xlu0 %v600_v49, %s1428_s2  ;;  %v1262_v53 = vadd.f32 %v1261_v52, %v1260_v51 }
 0x135   :  { %v1279_v54 = vpop.f32.mrb[12].mxu0 }
 0x136   :  { %v1280_v55 = vpop.f32.mrb[13].mxu0 }
 0x137   :  { %v1281_v56 = vadd.f32 %v1280_v55, %v1279_v54  ;;  %v1282_v57 = vpop.f32.mrb[14].mxu0 }
 0x138   :  { %v1283_v58 = vpop.f32.mrb[15].mxu0 }
 0x139   :  { %v951_v59 = vadd.f32 %v1281_v56, %v1253_v36  ;;  %v1284_v60 = vadd.f32 %v1283_v58, %v1282_v57 }
 0x13b   :  { %v954_v61 = vadd.f32 %v1284_v60, %v1256_v42  ;;  %v965_v62 = vsel %vm245_vm3, %v951_v59, -inf }
 0x13d   :  { %v967_v63 = vsel %vm966_vm8, %v954_v61, -inf  ;;  %v1285_v0 = vpop.f32.mrb[16].mxu0 }
 0x13e   :  { %v968_v1 = vmax.f32 %v965_v62, %v967_v63  ;;  %v1286_v2 = vpop.f32.mrb[17].mxu0 }
 0x13f   :  { %v1287_v3 = vadd.f32 %v1286_v2, %v1285_v0  ;;  %v1288_v4 = vpop.f32.mrb[18].mxu0 }
 0x140   :  { %v969_v5 = vrot.slane %v968_v1, 4  ;;  %v1289_v6 = vpop.f32.mrb[19].mxu0 }
 0x141   :  { %v959_v8 = vadd.f32 %v1287_v3, %v1259_v50  ;;  %v1290_v9 = vadd.f32 %v1289_v6, %v1288_v4 }
 0x142   :  { %v970_v10 = vmax.f32 %v968_v1, %v969_v5 }
 0x143   :  { %v962_v11 = vadd.f32 %v1290_v9, %v1262_v53  ;;  %v975_v12 = vsel %vm245_vm3, %v959_v8, -inf }
 0x144   :  { %v971_v14 = vrot.slane %v970_v10, 2 }
 0x145   :  { %v976_v13 = vsel %vm966_vm8, %v962_v11, -inf }
 0x146   :  { %v977_v15 = vmax.f32 %v975_v12, %v976_v13  ;;  %v972_v17 = vmax.f32 %v970_v10, %v971_v14 }
 0x148   :  { %v978_v16 = vrot.slane %v977_v15, 4  ;;  %v973_v20 = vrot.slane %v972_v17, 1 }
 0x14a   :  { %v979_v18 = vmax.f32 %v977_v15, %v978_v16  ;;  %v974_v25 = vmax.f32 %v972_v17, %v973_v20 }
 0x14c   :  { %v980_v19 = vrot.slane %v979_v18, 2 }
 0x14e   :  { %v981_v23 = vmax.f32 %v979_v18, %v980_v19 }
 0x150   :  { %v982_v24 = vrot.slane %v981_v23, 1 }
 0x152   :  { %v983_v26 = vmax.f32 %v981_v23, %v982_v24 }
 0x154   :  { %v984_v28 = vsel %vm265_vm5, %v974_v25, %v983_v26 }
 0x155   :  { %v992_v21 = vadd.f32 %v1164_v27, %v984_v28 }
 0x157   :  { %v993_v29 = vmax.f32 %v992_v21, 0.0 }
 0x159   :  { %999 = vrot.lane.b32.xlu0 %v993_v29, %s1430_s24 }
 0x1a1   :  { %v996_v32 = vpop.permute.xlu0 %995 }
 0x1a2   :  { %v1002_v34 = vsel %vm245_vm3, %v275_v33, %v996_v32 }
 0x1cb   :  { %v1000_v22 = vpop.permute.xlu0 %999 }
 0x1cc   :  { %v1004_v35 = vsel %vm1003_vm10, %v1002_v34, %v1000_v22 }
 0x1cd   :  { %v1005_v36 = vpack.c.bf16 %v1004_v35, %v1004_v35 }
 0x1cf   :  { %1319 = vmatmul.mubr.msk.bf16.vlgmr.msra.gmra.mrb[16].mxu1 %vm1025_vm11, %v1005_v36 }
 0x2a2   :  { %v1067_v38 = vpop.f32.mrb[16].mxu1 }
 0x2a3   :  { %v1068_v39 = vadd.f32 %v1165_v37, %v1067_v38  ;;  %v1320_v40 = vpop.f32.mrb[17].mxu1 }
 0x2a4   :  { %v1070_v7 = vpop.f32.mrb[18].mxu1 }
 0x2a5   :  { %1073 = vst [vmem:[#allocation2] sm:$0x3] %v1068_v39  ;;  %v1321_v41 = vpop.f32.mrb[19].mxu1 }
 0x2a6   :  { %1414 = shalt.err (!%p1411_p4)
}
 0x2a7   :  { %s1415_s8 = scalar_lea.hbm %s1805_s9, 32 }
 0x2a8   :  { %p1416_p5 = scmp.ne.s32.totalorder %s1805_s9, %s1415_s8  ;;  %p1419_p6 = scmp.lt.u32.totalorder %s1415_s8, %s1805_s9 }
 0x2aa   :  { %p1421_p7 = pnand %p1419_p6, %p1416_p5 }
 0x2ac   :  { %1424 = shalt.err (!%p1421_p7)
}
 0x2ad   :  { %1083 = dma.vmem_to_hbm [thread:$0]  %s1081_s29, 32, %s1805_s9, [#allocation3]  }
 0x2ae   :  { %1425 = dma.done.wait [#allocation3], 32  }
 0x2af   :  { %1426 = vsyncadd [#allocation3], 4294967264 }
 0x2b0   :  { %1087 = vsyncpa [#allocation3], 1 }

</bundles_post_ra>
